<compile_context>
chip_gen: v7x
topology: tpu7x:2x2x1
jax: 0.10.0
libtpu: 0.0.40
codegen_flags: <defaults>
</compile_context>

<pallas_src>
import functools
import math

import jax
import jax.numpy as jnp
from jax.experimental import pallas as pl
from jax.experimental.pallas import tpu as pltpu


# ---------------------------------------------------------------------------
# Kernels
# ---------------------------------------------------------------------------
def _ffn_kernel_single(x_ref, w1_ref, b1_ref, w2_ref, b2_ref, o_ref):
    # Weight-resident path: tn == hidden, one reduction step, no scratch.
    # x_ref: (tm, d_model); w1_ref: (d_model, hidden); b1_ref: (1, hidden) f32
    # w2_ref: (hidden, d_model); b2_ref: (1, d_model) f32; o_ref: (tm, d_model)
    h = jnp.dot(x_ref[...], w1_ref[...], preferred_element_type=jnp.float32)
    h = jnp.maximum(h + b1_ref[...], 0.0)
    y = jnp.dot(h.astype(w2_ref.dtype), w2_ref[...],
                preferred_element_type=jnp.float32)
    o_ref[...] = (y + b2_ref[...]).astype(o_ref.dtype)


def _ffn_kernel_multi(x_ref, w1_ref, b1_ref, w2_ref, b2_ref, o_ref, acc_ref):
    # Streaming path: hidden is split into nsteps slices along grid axis 1.
    # w1_ref: (d_model, tn); b1_ref: (1, tn) f32; w2_ref: (tn, d_model)
    # acc_ref: (tm, d_model) f32 accumulator (output tile is grid-resident).
    j = pl.program_id(1)

    h = jnp.dot(x_ref[...], w1_ref[...], preferred_element_type=jnp.float32)
    h = jnp.maximum(h + b1_ref[...], 0.0)
    part = jnp.dot(h.astype(w2_ref.dtype), w2_ref[...],
                   preferred_element_type=jnp.float32)

    @pl.when(j == 0)
    def _():
        acc_ref[...] = part          # first step: plain store, no zero-init RMW

    @pl.when(j != 0)
    def _():
        acc_ref[...] += part

    @pl.when(j == pl.num_programs(1) - 1)
    def _():
        o_ref[...] = (acc_ref[...] + b2_ref[...]).astype(o_ref.dtype)


# ---------------------------------------------------------------------------
# Tile / VMEM selection (pure Python, runs at trace time)
# ---------------------------------------------------------------------------
def _round_up(x, m):
    return ((x + m - 1) // m) * m


def _tpu_kind():
    try:
        return jax.devices()[0].device_kind.lower()
    except Exception:  # pragma: no cover - CPU / interpret fallback
        return ""


def _vmem_bytes(tm, tn, d_model, in_bytes, out_bytes, weight_resident):
    """Rough VMEM footprint: double-buffered I/O tiles + scratch + h temp."""
    x_buf = 2 * tm * d_model * in_bytes
    o_buf = 2 * tm * d_model * out_bytes
    w_buf = 2 * 2 * tn * d_model * in_bytes          # W1 slice + W2 slice, 2 bufs
    b_buf = 2 * (tn + d_model) * 4
    acc = 0 if weight_resident else tm * d_model * 4  # f32 accumulator scratch
    h_tmp = tm * tn * 4                               # compiler temp for h (f32)
    return x_buf + o_buf + w_buf + b_buf + acc + h_tmp


def _select_config(M, d_model, hidden, in_bytes, out_bytes, tm_req, tn_req):
    kind = _tpu_kind()
    if "v5 lite" in kind or "v5e" in kind or "v5lite" in kind:
        tm_def, vmem_cap = 256, 100 << 20     # 128 MiB physical
    elif "v6" in kind:
        tm_def, vmem_cap = 1024, 100 << 20    # 128 MiB physical, 1.4 TB/s HBM
    elif "v7" in kind or "7x" in kind:
        tm_def, vmem_cap = 512, 48 << 20      # 64 MiB physical per TC
    else:
        tm_def, vmem_cap = 512, 64 << 20

    # Sublane-native row alignment per element size (f32:8, bf16:16, int8:32).
    row_align = {4: 8, 2: 16, 1: 32}.get(in_bytes, 8)

    if tm_req is None:
        tm = min(tm_def, _round_up(M, row_align))
    else:
        tm = min(_round_up(tm_req, row_align), _round_up(M, row_align))
    tm = max(tm, row_align)

    # Hidden-tile candidates, largest first.  tn == hidden => weight-resident.
    lane_divs = sorted(
        (d for d in range(128, hidden, 128) if hidden % d == 0), reverse=True)
    cands = [hidden] + lane_divs
    if tn_req is not None:
        filtered = [t for t in cands if t <= max(tn_req, 128)]
        cands = filtered or [hidden]

    while True:
        for tn in cands:
            est = _vmem_bytes(tm, tn, d_model, in_bytes, out_bytes, tn == hidden)
            if est <= vmem_cap:
                limit = min(vmem_cap, max(est + (est >> 2) + (2 << 20), 32 << 20))
                return tm, tn, limit
        if tm <= 128:
            break
        tm = max(128, _round_up(tm // 2, row_align))

    # Best effort (degenerate, enormous d_model): smallest tn at minimum tm.
    tn = cands[-1]
    est = _vmem_bytes(tm, tn, d_model, in_bytes, out_bytes, tn == hidden)
    limit = min(vmem_cap, max(est + (est >> 2) + (2 << 20), 32 << 20))
    return tm, tn, limit


# ---------------------------------------------------------------------------
# Public wrapper
# ---------------------------------------------------------------------------
@functools.partial(jax.jit, static_argnames=("tm", "tn", "compute_dtype"))
def pointwise_feed_forward(x, w1, b1, w2, b2, *, tm=None, tn=None,
                           compute_dtype=None):
    """y = relu(x @ w1.T + b1) @ w2.T + b2 over the last dim of x.

    Parameter shapes follow PyTorch nn.Linear:
      w1: (hidden, d_model), b1: (hidden,), w2: (d_model, hidden), b2: (d_model,)
    d_model multiple of 128 (hence hidden multiple of 512) is the lane-dense
    fast path.  Pass compute_dtype=jnp.bfloat16 for the fast MXU path (f32
    accumulation is kept); the default uses the input dtype unchanged.
    """
    d_model = x.shape[-1]
    hidden = w1.shape[0]
    lead = x.shape[:-1]
    M = int(math.prod(lead)) if lead else 1
    out_dtype = x.dtype

    wdt = jnp.dtype(compute_dtype) if compute_dtype is not None else jnp.dtype(x.dtype)
    in_bytes = wdt.itemsize
    out_bytes = jnp.dtype(out_dtype).itemsize

    tm_eff, tn_eff, vmem_limit = _select_config(
        M, d_model, hidden, in_bytes, out_bytes, tm, tn)
    nsteps = hidden // tn_eff

    # One-time wrapper-side layout work: flatten rows, transpose weights so
    # both in-kernel matmuls are NN (no per-step XLU transpose of weight tiles).
    x2 = x.reshape(M, d_model).astype(wdt)
    w1t = w1.T.astype(wdt)                       # (d_model, hidden)
    w2t = w2.T.astype(wdt)                       # (hidden, d_model)
    b1_r = b1.reshape(1, hidden).astype(jnp.float32)
    b2_r = b2.reshape(1, d_model).astype(jnp.float32)

    M_pad = _round_up(M, tm_eff)
    if M_pad != M:
        x2 = jnp.pad(x2, ((0, M_pad - M), (0, 0)))

    grid = (M_pad // tm_eff, nsteps)

    in_specs = [
        pl.BlockSpec((tm_eff, d_model), lambda i, j: (i, 0)),    # x rows
        pl.BlockSpec((d_model, tn_eff), lambda i, j: (0, j)),    # W1^T slice
        pl.BlockSpec((1, tn_eff), lambda i, j: (0, j)),          # b1 slice
        pl.BlockSpec((tn_eff, d_model), lambda i, j: (j, 0)),    # W2^T slice
        pl.BlockSpec((1, d_model), lambda i, j: (0, 0)),         # b2
    ]
    out_spec = pl.BlockSpec((tm_eff, d_model), lambda i, j: (i, 0))

    if nsteps == 1:
        kernel = _ffn_kernel_single
        scratch = []
    else:
        kernel = _ffn_kernel_multi
        scratch = [pltpu.VMEM((tm_eff, d_model), jnp.float32)]

    out = pl.pallas_call(
        kernel,
        out_shape=jax.ShapeDtypeStruct((M_pad, d_model), out_dtype),
        grid_spec=pltpu.PrefetchScalarGridSpec(
            num_scalar_prefetch=0,
            grid=grid,
            in_specs=in_specs,
            out_specs=out_spec,
            scratch_shapes=scratch,
        ),
        compiler_params=pltpu.CompilerParams(
            dimension_semantics=("parallel", "arbitrary"),
            vmem_limit_bytes=int(vmem_limit),
        ),
    )(x2, w1t, b1_r, w2t, b2_r)

    if M_pad != M:
        out = out[:M]
    return out.reshape(*lead, d_model)


# ---------------------------------------------------------------------------
# Param init (nn.Linear-compatible shapes) and reference
# ---------------------------------------------------------------------------
def init_params(key, d_model, dtype=jnp.float32):
    """W1: (4*d_model, d_model), b1: (4*d_model,),
    W2: (d_model, 4*d_model), b2: (d_model,)."""
    hidden = 4 * d_model
    k1, k2, k3, k4 = jax.random.split(key, 4)
    lim1 = 1.0 / (d_model ** 0.5)
    lim2 = 1.0 / (hidden ** 0.5)
    w1 = jax.random.uniform(k1, (hidden, d_model), dtype, -lim1, lim1)
    b1 = jax.random.uniform(k2, (hidden,), dtype, -lim1, lim1)
    w2 = jax.random.uniform(k3, (d_model, hidden), dtype, -lim2, lim2)
    b2 = jax.random.uniform(k4, (d_model,), dtype, -lim2, lim2)
    return w1, b1, w2, b2


def _reference(x, w1, b1, w2, b2):
    return jnp.maximum(x @ w1.T + b1, 0.0) @ w2.T + b2


if __name__ == "__main__":
    key = jax.random.PRNGKey(0)
    kx, kp, kx2 = jax.random.split(key, 3)

    # Lane-dense d_model (multiple of 128); hidden = 4*d_model = 512.
    batch, seq, d_model = 2, 8, 128
    x = jax.random.normal(kx, (batch, seq, d_model), jnp.float32)
    w1, b1, w2, b2 = init_params(kp, d_model)
    ref = _reference(x, w1, b1, w2, b2)

    # 1) Default config (weight-resident single-step path at this size), f32.
    y = jax.block_until_ready(pointwise_feed_forward(x, w1, b1, w2, b2))
    assert y.shape == (batch, seq, d_model)
    assert jnp.allclose(y, ref, atol=1e-3, rtol=1e-3)

    # 2) Forced streaming path (tn=128 -> 4 reduction steps, f32 accumulator).
    y_s = jax.block_until_ready(
        pointwise_feed_forward(x, w1, b1, w2, b2, tn=128))
    assert jnp.allclose(y_s, ref, atol=1e-3, rtol=1e-3)

    # 3) Row-padding path (M = 30, not a tile multiple).
    x_odd = jax.random.normal(kx2, (3, 10, d_model), jnp.float32)
    y_odd = jax.block_until_ready(
        pointwise_feed_forward(x_odd, w1, b1, w2, b2))
    ref_odd = _reference(x_odd, w1, b1, w2, b2)
    assert y_odd.shape == (3, 10, d_model)
    assert jnp.allclose(y_odd, ref_odd, atol=1e-3, rtol=1e-3)

    # 4) bf16 fast path (f32 accumulation), loose tolerance vs f32 reference.
    y_bf = jax.block_until_ready(
        pointwise_feed_forward(x, w1, b1, w2, b2, compute_dtype=jnp.bfloat16))
    assert y_bf.dtype == x.dtype
    assert jnp.allclose(y_bf, ref, atol=7.5e-2, rtol=7.5e-2)

    print("KERNEL_OK")
</pallas_src>

<mosaic_0001>
module attributes {stable_mosaic.version = 11 : i64} {
  func.func @_ffn_kernel_single(%arg0: i32, %arg1: i32, %arg2: memref<16x128xf32, #tpu.memory_space<vmem>>, %arg3: memref<128x512xf32, #tpu.memory_space<vmem>>, %arg4: memref<1x512xf32, #tpu.memory_space<vmem>>, %arg5: memref<512x128xf32, #tpu.memory_space<vmem>>, %arg6: memref<1x128xf32, #tpu.memory_space<vmem>>, %arg7: memref<16x128xf32, #tpu.memory_space<vmem>>) attributes {dimension_semantics = [#tpu.dimension_semantics<parallel>, #tpu.dimension_semantics<arbitrary>], iteration_bounds = array<i64: 1, 1>, scalar_prefetch = 0 : i64, scratch_operands = 0 : i64, tpu.core_type = #tpu.core_type<tc>, window_params = [{transform_indices = @transform_0, window_bounds = array<i64: 16, 128>}, {transform_indices = @transform_1, window_bounds = array<i64: 128, 512>}, {transform_indices = @transform_2, window_bounds = array<i64: 1, 512>}, {transform_indices = @transform_3, window_bounds = array<i64: 512, 128>}, {pipeline_mode = #tpu.pipeline_mode<synchronous>, transform_indices = @transform_4, window_bounds = array<i64: 1, 128>}, {transform_indices = @transform_5, window_bounds = array<i64: 16, 128>}]} {
    %c0 = arith.constant 0 : index
    %c0_0 = arith.constant 0 : index
    %0 = vector.load %arg2[%c0, %c0_0] : memref<16x128xf32, #tpu.memory_space<vmem>>, vector<16x128xf32>
    %c0_1 = arith.constant 0 : index
    %c0_2 = arith.constant 0 : index
    %1 = vector.load %arg3[%c0_1, %c0_2] : memref<128x512xf32, #tpu.memory_space<vmem>>, vector<128x512xf32>
    %cst = arith.constant dense<0.000000e+00> : vector<16x512xf32>
    %2 = tpu.matmul %0, %1, %cst {dimension_numbers = #tpu.dot_dimension_numbers<[1], [0], [0], [1], [0, 0, 1, 1], [], []>} : vector<16x128xf32>, vector<128x512xf32>, vector<16x512xf32> -> vector<16x512xf32>
    %c0_3 = arith.constant 0 : index
    %c0_4 = arith.constant 0 : index
    %3 = vector.load %arg4[%c0_3, %c0_4] : memref<1x512xf32, #tpu.memory_space<vmem>>, vector<1x512xf32>
    %4 = vector.broadcast %3 : vector<1x512xf32> to vector<16x512xf32>
    %5 = arith.addf %2, %4 : vector<16x512xf32>
    %cst_5 = arith.constant 0.000000e+00 : f32
    %6 = vector.broadcast %cst_5 : f32 to vector<16x512xf32>
    %7 = arith.maximumf %5, %6 : vector<16x512xf32>
    %c0_6 = arith.constant 0 : index
    %c0_7 = arith.constant 0 : index
    %8 = vector.load %arg5[%c0_6, %c0_7] : memref<512x128xf32, #tpu.memory_space<vmem>>, vector<512x128xf32>
    %cst_8 = arith.constant dense<0.000000e+00> : vector<16x128xf32>
    %9 = tpu.matmul %7, %8, %cst_8 {dimension_numbers = #tpu.dot_dimension_numbers<[1], [0], [0], [1], [0, 0, 1, 1], [], []>} : vector<16x512xf32>, vector<512x128xf32>, vector<16x128xf32> -> vector<16x128xf32>
    %c0_9 = arith.constant 0 : index
    %c0_10 = arith.constant 0 : index
    %10 = vector.load %arg6[%c0_9, %c0_10] : memref<1x128xf32, #tpu.memory_space<vmem>>, vector<1x128xf32>
    %11 = vector.broadcast %10 : vector<1x128xf32> to vector<16x128xf32>
    %12 = arith.addf %9, %11 : vector<16x128xf32>
    %c0_11 = arith.constant 0 : index
    %c0_12 = arith.constant 0 : index
    %13 = vector.load %arg7[%c0_11, %c0_12] : memref<16x128xf32, #tpu.memory_space<vmem>>, vector<16x128xf32>
    tpu.vector_store %arg7[%c0_11, %c0_12], %12 {strides = array<i32>} : memref<16x128xf32, #tpu.memory_space<vmem>>, vector<16x128xf32>,
    return
  }
  func.func @transform_0(%arg0: i32, %arg1: i32) -> (i32, i32) {
    %c0_i32 = arith.constant 0 : i32
    %c0_i32_0 = arith.constant 0 : i32
    return %arg0, %c0_i32 : i32, i32
  }
  func.func @transform_1(%arg0: i32, %arg1: i32) -> (i32, i32) {
    %c0_i32 = arith.constant 0 : i32
    %c0_i32_0 = arith.constant 0 : i32
    return %c0_i32, %arg1 : i32, i32
  }
  func.func @transform_2(%arg0: i32, %arg1: i32) -> (i32, i32) {
    %c0_i32 = arith.constant 0 : i32
    %c0_i32_0 = arith.constant 0 : i32
    return %c0_i32, %arg1 : i32, i32
  }
  func.func @transform_3(%arg0: i32, %arg1: i32) -> (i32, i32) {
    %c0_i32 = arith.constant 0 : i32
    %c0_i32_0 = arith.constant 0 : i32
    return %arg1, %c0_i32 : i32, i32
  }
  func.func @transform_4(%arg0: i32, %arg1: i32) -> (i32, i32) {
    %c0_i32 = arith.constant 0 : i32
    %c0_i32_0 = arith.constant 0 : i32
    %c0_i32_1 = arith.constant 0 : i32
    return %c0_i32, %c0_i32_0 : i32, i32
  }
  func.func @transform_5(%arg0: i32, %arg1: i32) -> (i32, i32) {
    %c0_i32 = arith.constant 0 : i32
    %c0_i32_0 = arith.constant 0 : i32
    return %arg0, %c0_i32 : i32, i32
  }
}

</mosaic_0001>

<bundles_post_ra>
// kernel: pointwise_feed_forward.1
= control target key start
LH: loop header
LB: loop body
LE: loop exit
PB: predicated region body
PF: predicated region fallthrough
CT: control target
= control target key end

     0   :  { %v743_v7 = vmov 0.0   ;;  %s1189_s0 = inlined_call_operand.vmem [shape: f32[16,128], index: 0, kind: input, shape index: {}]   ;;  %s1190_s1 = inlined_call_operand.vmem [shape: f32[128,512], index: 1, kind: input, shape index: {}]   ;;  %s1191_s2 = inlined_call_operand.vmem [shape: f32[1,512], index: 2, kind: input, shape index: {}]   ;;  %s1192_s3 = inlined_call_operand.vmem [shape: f32[512,128], index: 3, kind: input, shape index: {}]   ;;  %s1193_s4 = inlined_call_operand.vmem [shape: f32[1,128], index: 4, kind: input, shape index: {}]   ;;  %s1194_s5 = inlined_call_operand.hbm [shape: f32[16,128], index: 5, kind: output, shape index: {}]  }
   0x1   :  { %v24_v0 = vld [vmem:[%s1190_s1 + $0x8] sm:$0xff]  ;;  %v26_v2 = vld [vmem:[%s1190_s1 + $0x18] sm:$0xff]  ;;  %v23_v5 = vld [vmem:[%s1190_s1] sm:$0xff]  ;;  %173 = vmatprep.mubr.f32.mxu0 %v743_v7  ;;  %250 = vmatprep.mubr.f32.mxu1 %v743_v7 }
   0x2   :  { %v28_v1 = vld [vmem:[%s1190_s1 + $0x28] sm:$0xff]  ;;  %v30_v4 = vld [vmem:[%s1190_s1 + $0x38] sm:$0xff]  ;;  %v27_v6 = vld [vmem:[%s1190_s1 + $0x20] sm:$0xff] }
   0x3   :  { %v587_v3 = vpack.c.bf16 %v28_v1, %v24_v0  ;;  %v619_v8 = vpack.c.bf16 %v30_v4, %v26_v2  ;;  %v589_v9 = vpack.c.bf16 %v27_v6, %v23_v5  ;;  %v25_v10 = vld [vmem:[%s1190_s1 + $0x10] sm:$0xff]  ;;  %v32_v12 = vld [vmem:[%s1190_s1 + $0x48] sm:$0xff]  ;;  %v34_v15 = vld [vmem:[%s1190_s1 + $0x58] sm:$0xff] }
   0x4   :  { %v29_v11 = vld [vmem:[%s1190_s1 + $0x30] sm:$0xff]  ;;  %v36_v14 = vld [vmem:[%s1190_s1 + $0x68] sm:$0xff]  ;;  %v38_v16 = vld [vmem:[%s1190_s1 + $0x78] sm:$0xff] }
   0x5   :  { %588 = vmatprep.subr.bf16.mxu0 %v587_v3  ;;  %v621_v13 = vpack.c.bf16 %v29_v11, %v25_v10  ;;  %620 = vmatprep.subr.bf16.mxu1 %v619_v8  ;;  %v591_v17 = vpack.c.bf16 %v36_v14, %v32_v12  ;;  %v623_v18 = vpack.c.bf16 %v38_v16, %v34_v15  ;;  %v31_v19 = vld [vmem:[%s1190_s1 + $0x40] sm:$0xff]  ;;  %v33_v21 = vld [vmem:[%s1190_s1 + $0x50] sm:$0xff]  ;;  %v40_v24 = vld [vmem:[%s1190_s1 + $0x88] sm:$0xff] }
   0x6   :  { %590 = vmatpush1.bf16.msra.mxu0 %v589_v9  ;;  %v35_v20 = vld [vmem:[%s1190_s1 + $0x60] sm:$0xff]  ;;  %v37_v23 = vld [vmem:[%s1190_s1 + $0x70] sm:$0xff]  ;;  %v44_v25 = vld [vmem:[%s1190_s1 + $0xa8] sm:$0xff] }
   0x7   :  { %622 = vmatpush1.bf16.msra.mxu1 %v621_v13  ;;  %v593_v22 = vpack.c.bf16 %v35_v20, %v31_v19  ;;  %592 = vmatprep.subr.bf16.mxu0 %v591_v17  ;;  %v625_v26 = vpack.c.bf16 %v37_v23, %v33_v21  ;;  %v595_v27 = vpack.c.bf16 %v44_v25, %v40_v24  ;;  %v42_v28 = vld [vmem:[%s1190_s1 + $0x98] sm:$0xff]  ;;  %v39_v30 = vld [vmem:[%s1190_s1 + $0x80] sm:$0xff]  ;;  %v41_v33 = vld [vmem:[%s1190_s1 + $0x90] sm:$0xff] }
   0x8   :  { %624 = vmatprep.subr.bf16.mxu1 %v623_v18  ;;  %v46_v29 = vld [vmem:[%s1190_s1 + $0xb8] sm:$0xff]  ;;  %v43_v32 = vld [vmem:[%s1190_s1 + $0xa0] sm:$0xff]  ;;  %v45_v34 = vld [vmem:[%s1190_s1 + $0xb0] sm:$0xff] }
   0x9   :  { %v627_v31 = vpack.c.bf16 %v46_v29, %v42_v28  ;;  %v597_v35 = vpack.c.bf16 %v43_v32, %v39_v30  ;;  %v48_v36 = vld [vmem:[%s1190_s1 + $0xc8] sm:$0xff]  ;;  %v50_v38 = vld [vmem:[%s1190_s1 + $0xd8] sm:$0xff]  ;;  %v629_v39 = vpack.c.bf16 %v45_v34, %v41_v33  ;;  %v47_v42 = vld [vmem:[%s1190_s1 + $0xc0] sm:$0xff] }
   0xa   :  { %594 = vmatpush1.bf16.msra.mxu0 %v593_v22  ;;  %v52_v37 = vld [vmem:[%s1190_s1 + $0xe8] sm:$0xff]  ;;  %v54_v41 = vld [vmem:[%s1190_s1 + $0xf8] sm:$0xff]  ;;  %v51_v43 = vld [vmem:[%s1190_s1 + $0xe0] sm:$0xff] }
   0xb   :  { %626 = vmatpush1.bf16.msra.mxu1 %v625_v26  ;;  %596 = vmatprep.subr.bf16.mxu0 %v595_v27  ;;  %v599_v40 = vpack.c.bf16 %v52_v37, %v48_v36  ;;  %v631_v44 = vpack.c.bf16 %v54_v41, %v50_v38  ;;  %v49_v45 = vld [vmem:[%s1190_s1 + $0xd0] sm:$0xff]  ;;  %v56_v47 = vld [vmem:[%s1190_s1 + $0x108] sm:$0xff]  ;;  %v58_v49 = vld [vmem:[%s1190_s1 + $0x118] sm:$0xff]  ;;  %v601_v51 = vpack.c.bf16 %v51_v43, %v47_v42 }
   0xc   :  { %628 = vmatprep.subr.bf16.mxu1 %v627_v31  ;;  %v53_v46 = vld [vmem:[%s1190_s1 + $0xf0] sm:$0xff]  ;;  %v60_v48 = vld [vmem:[%s1190_s1 + $0x128] sm:$0xff]  ;;  %v62_v50 = vld [vmem:[%s1190_s1 + $0x138] sm:$0xff] }
   0xd   :  { %v633_v52 = vpack.c.bf16 %v53_v46, %v49_v45  ;;  %v603_v53 = vpack.c.bf16 %v60_v48, %v56_v47  ;;  %v55_v54 = vld [vmem:[%s1190_s1 + $0x100] sm:$0xff]  ;;  %v57_v56 = vld [vmem:[%s1190_s1 + $0x110] sm:$0xff]  ;;  %v635_v57 = vpack.c.bf16 %v62_v50, %v58_v49  ;;  %v64_v59 = vld [vmem:[%s1190_s1 + $0x148] sm:$0xff] }
   0xe   :  { %598 = vmatpush1.bf16.msra.mxu0 %v597_v35  ;;  %v59_v55 = vld [vmem:[%s1190_s1 + $0x120] sm:$0xff]  ;;  %v61_v58 = vld [vmem:[%s1190_s1 + $0x130] sm:$0xff]  ;;  %v68_v60 = vld [vmem:[%s1190_s1 + $0x168] sm:$0xff] }
   0xf   :  { %630 = vmatpush1.bf16.msra.mxu1 %v629_v39  ;;  %600 = vmatprep.subr.bf16.mxu0 %v599_v40  ;;  %v66_v61 = vld [vmem:[%s1190_s1 + $0x158] sm:$0xff]  ;;  %v605_v63 = vpack.c.bf16 %v59_v55, %v55_v54  ;;  %v637_v0 = vpack.c.bf16 %v61_v58, %v57_v56  ;;  %v607_v1 = vpack.c.bf16 %v68_v60, %v64_v59  ;;  %v63_v2 = vld [vmem:[%s1190_s1 + $0x140] sm:$0xff]  ;;  %v65_v4 = vld [vmem:[%s1190_s1 + $0x150] sm:$0xff] }
  0x10   :  { %632 = vmatprep.subr.bf16.mxu1 %v631_v44  ;;  %v70_v62 = vld [vmem:[%s1190_s1 + $0x178] sm:$0xff]  ;;  %v67_v3 = vld [vmem:[%s1190_s1 + $0x160] sm:$0xff]  ;;  %v69_v6 = vld [vmem:[%s1190_s1 + $0x170] sm:$0xff] }
  0x11   :  { %v639_v5 = vpack.c.bf16 %v70_v62, %v66_v61  ;;  %v72_v8 = vld [vmem:[%s1190_s1 + $0x188] sm:$0xff]  ;;  %v74_v10 = vld [vmem:[%s1190_s1 + $0x198] sm:$0xff]  ;;  %v609_v12 = vpack.c.bf16 %v67_v3, %v63_v2  ;;  %v641_v13 = vpack.c.bf16 %v69_v6, %v65_v4  ;;  %v71_v15 = vld [vmem:[%s1190_s1 + $0x180] sm:$0xff] }
  0x12   :  { %602 = vmatpush1.bf16.msra.mxu0 %v601_v51  ;;  %v76_v9 = vld [vmem:[%s1190_s1 + $0x1a8] sm:$0xff]  ;;  %v78_v11 = vld [vmem:[%s1190_s1 + $0x1b8] sm:$0xff]  ;;  %v75_v16 = vld [vmem:[%s1190_s1 + $0x1a0] sm:$0xff] }
  0x13   :  { %634 = vmatpush1.bf16.msra.mxu1 %v633_v52  ;;  %604 = vmatprep.subr.bf16.mxu0 %v603_v53  ;;  %v611_v14 = vpack.c.bf16 %v76_v9, %v72_v8  ;;  %v73_v17 = vld [vmem:[%s1190_s1 + $0x190] sm:$0xff]  ;;  %v643_v18 = vpack.c.bf16 %v78_v11, %v74_v10  ;;  %v80_v20 = vld [vmem:[%s1190_s1 + $0x1c8] sm:$0xff]  ;;  %v82_v22 = vld [vmem:[%s1190_s1 + $0x1d8] sm:$0xff]  ;;  %v613_v24 = vpack.c.bf16 %v75_v16, %v71_v15 }
  0x14   :  { %636 = vmatprep.subr.bf16.mxu1 %v635_v57  ;;  %v77_v19 = vld [vmem:[%s1190_s1 + $0x1b0] sm:$0xff]  ;;  %v84_v21 = vld [vmem:[%s1190_s1 + $0x1e8] sm:$0xff]  ;;  %v86_v23 = vld [vmem:[%s1190_s1 + $0x1f8] sm:$0xff] }
  0x15   :  { %v645_v25 = vpack.c.bf16 %v77_v19, %v73_v17  ;;  %v615_v26 = vpack.c.bf16 %v84_v21, %v80_v20  ;;  %v79_v27 = vld [vmem:[%s1190_s1 + $0x1c0] sm:$0xff]  ;;  %v81_v29 = vld [vmem:[%s1190_s1 + $0x1d0] sm:$0xff]  ;;  %v647_v30 = vpack.c.bf16 %v86_v23, %v82_v22  ;;  %v288_v33 = vld [vmem:[%s1192_s3 + $0x88] sm:$0xff] }
  0x16   :  { %606 = vmatpush1.bf16.msra.mxu0 %v605_v63  ;;  %v83_v28 = vld [vmem:[%s1190_s1 + $0x1e0] sm:$0xff]  ;;  %v85_v31 = vld [vmem:[%s1190_s1 + $0x1f0] sm:$0xff]  ;;  %v320_v35 = vld [vmem:[%s1192_s3 + $0x188] sm:$0xff] }
  0x17   :  { %638 = vmatpush1.bf16.msra.mxu1 %v637_v0  ;;  %608 = vmatprep.subr.bf16.mxu0 %v607_v1  ;;  %v287_v32 = vld [vmem:[%s1192_s3 + $0x80] sm:$0xff]  ;;  %v617_v36 = vpack.c.bf16 %v83_v28, %v79_v27  ;;  %v649_v37 = vpack.c.bf16 %v85_v31, %v81_v29  ;;  %v272_v41 = vld [vmem:[%s1192_s3 + $0x8] sm:$0xff]  ;;  %v289_v44 = vld [vmem:[%s1192_s3 + $0x90] sm:$0xff] }
  0x18   :  { %640 = vmatprep.subr.bf16.mxu1 %v639_v5  ;;  %v319_v34 = vld [vmem:[%s1192_s3 + $0x180] sm:$0xff]  ;;  %v651_v38 = vpack.c.bf16 %v288_v33, %v287_v32  ;;  %v304_v43 = vld [vmem:[%s1192_s3 + $0x108] sm:$0xff]  ;;  %v290_v45 = vld [vmem:[%s1192_s3 + $0x98] sm:$0xff] }
  0x19   :  { %v683_v39 = vpack.c.bf16 %v320_v35, %v319_v34  ;;  %v271_v40 = vld [vmem:[%s1192_s3] sm:$0xff]  ;;  %v321_v47 = vld [vmem:[%s1192_s3 + $0x190] sm:$0xff]  ;;  %v322_v48 = vld [vmem:[%s1192_s3 + $0x198] sm:$0xff]  ;;  %v655_v51 = vpack.c.bf16 %v290_v45, %v289_v44 }
  0x1a   :  { %610 = vmatpush1.bf16.msra.mxu0 %v609_v12  ;;  %v303_v42 = vld [vmem:[%s1192_s3 + $0x100] sm:$0xff]  ;;  %v653_v49 = vpack.c.bf16 %v272_v41, %v271_v40  ;;  %v273_v52 = vld [vmem:[%s1192_s3 + $0x10] sm:$0xff]  ;;  %v274_v53 = vld [vmem:[%s1192_s3 + $0x18] sm:$0xff]  ;;  %v687_v55 = vpack.c.bf16 %v322_v48, %v321_v47 }
  0x1b   :  { %642 = vmatpush1.bf16.msra.mxu1 %v641_v13  ;;  %612 = vmatprep.subr.bf16.mxu0 %v611_v14  ;;  %v21_v46 = vld [vmem:[%s1189_s0] sm:$0xff]  ;;  %v685_v50 = vpack.c.bf16 %v304_v43, %v303_v42  ;;  %v305_v54 = vld [vmem:[%s1192_s3 + $0x110] sm:$0xff]  ;;  %v306_v56 = vld [vmem:[%s1192_s3 + $0x118] sm:$0xff]  ;;  %v657_v62 = vpack.c.bf16 %v274_v53, %v273_v52 }
  0x1c   :  { %644 = vmatprep.subr.bf16.mxu1 %v643_v18  ;;  %v291_v57 = vld [vmem:[%s1192_s3 + $0xa0] sm:$0xff]  ;;  %v292_v58 = vld [vmem:[%s1192_s3 + $0xa8] sm:$0xff]  ;;  %v689_v0 = vpack.c.bf16 %v306_v56, %v305_v54  ;;  %v293_v5 = vld [vmem:[%s1192_s3 + $0xb0] sm:$0xff] }
  0x1d   :  { %v22_v59 = vld [vmem:[%s1189_s0 + $0x8] sm:$0xff]  ;;  %v323_v60 = vld [vmem:[%s1192_s3 + $0x1a0] sm:$0xff]  ;;  %v659_v1 = vpack.c.bf16 %v292_v58, %v291_v57  ;;  %v294_v6 = vld [vmem:[%s1192_s3 + $0xb8] sm:$0xff] }
  0x1e   :  { %614 = vmatpush1.bf16.msra.mxu0 %v613_v24  ;;  %v324_v61 = vld [vmem:[%s1192_s3 + $0x1a8] sm:$0xff]  ;;  %v275_v63 = vld [vmem:[%s1192_s3 + $0x20] sm:$0xff] }
  0x1f   :  { %646 = vmatpush1.bf16.msra.mxu1 %v645_v25  ;;  %616 = vmatprep.subr.bf16.mxu0 %v615_v26  ;;  %v276_v2 = vld [vmem:[%s1192_s3 + $0x28] sm:$0xff]  ;;  %v307_v3 = vld [vmem:[%s1192_s3 + $0x120] sm:$0xff]  ;;  %v691_v4 = vpack.c.bf16 %v324_v61, %v323_v60 }
  0x20   :  { %648 = vmatprep.subr.bf16.mxu1 %v647_v30 }
  0x22   :  { %618 = vmatpush1.bf16.msra.mxu0 %v617_v36 }
  0x23   :  { %650 = vmatpush1.bf16.msra.mxu1 %v649_v37  ;;  %652 = vmatprep.subr.bf16.mxu0 %v651_v38 }
  0x24   :  { %684 = vmatprep.subr.bf16.mxu1 %v683_v39 }
  0x25   :  { %174 = vmatmul.mubr.f32.vlgmr.msra.gmra.mrb[0].mxu0 %v21_v46 }
  0x26   :  { %251 = vmatmul.mubr.f32.vlgmr.msra.gmra.mrb[0].mxu1 %v21_v46  ;;  %179 = vmatprep.mubr.f32.mxu0 %v743_v7 }
  0x27   :  { %256 = vmatprep.mubr.f32.mxu1 %v743_v7  ;;  %654 = vmatpush3.bf16.msra.mxu0 %v653_v49  ;;  %v308_v7 = vld [vmem:[%s1192_s3 + $0x128] sm:$0xff] }
  0x28   :  { %686 = vmatpush3.bf16.msra.mxu1 %v685_v50  ;;  %656 = vmatprep.subr.bf16.mxu0 %v655_v51 }
  0x29   :  { %180 = vmatmul.mubr.f32.gmra.mrb[2].mxu0 %v22_v59  ;;  %688 = vmatprep.subr.bf16.mxu1 %v687_v55 }
  0x2a   :  { %10 = vsyncpa [#allocation3], 0  ;;  %257 = vmatmul.mubr.f32.gmra.mrb[2].mxu1 %v22_v59  ;;  %v325_v8 = vld [vmem:[%s1192_s3 + $0x1b0] sm:$0xff]  ;;  %v326_v9 = vld [vmem:[%s1192_s3 + $0x1b8] sm:$0xff]  ;;  %v661_v10 = vpack.c.bf16 %v276_v2, %v275_v63  ;;  %v693_v11 = vpack.c.bf16 %v308_v7, %v307_v3  ;;  %v663_v12 = vpack.c.bf16 %v294_v6, %v293_v5  ;;  %v89_v7 = vlaneseq  ;;  %s744_s21 = smov [#allocation2]  }
  0x2b   :  { %658 = vmatpush3.bf16.msra.mxu0 %v657_v62  ;;  %v277_v13 = vld [vmem:[%s1192_s3 + $0x30] sm:$0xff]  ;;  %v278_v14 = vld [vmem:[%s1192_s3 + $0x38] sm:$0xff]  ;;  %v695_v16 = vpack.c.bf16 %v326_v9, %v325_v8  ;;  %v295_v18 = vld [vmem:[%s1192_s3 + $0xc0] sm:$0xff]  ;;  %s499_s22 = sshll.u32 %s744_s21, 4  ;;  %s500_s22 = int_to_ptr.vmem [resolvable:$true] %s499_s22 }
  0x2c   :  { %690 = vmatpush3.bf16.msra.mxu1 %v689_v0  ;;  %660 = vmatprep.subr.bf16.mxu0 %v659_v1  ;;  %v309_v15 = vld [vmem:[%s1192_s3 + $0x130] sm:$0xff]  ;;  %v310_v17 = vld [vmem:[%s1192_s3 + $0x138] sm:$0xff]  ;;  %v296_v19 = vld [vmem:[%s1192_s3 + $0xc8] sm:$0xff]  ;;  %v665_v22 = vpack.c.bf16 %v278_v14, %v277_v13  ;;  %p724_p1 = scmp.lt.s32.totalorder %s500_s22, %s500_s22 }
  0x2d   :  { %692 = vmatprep.subr.bf16.mxu1 %v691_v4  ;;  %v327_v20 = vld [vmem:[%s1192_s3 + $0x1c0] sm:$0xff]  ;;  %v328_v21 = vld [vmem:[%s1192_s3 + $0x1c8] sm:$0xff]  ;;  %v697_v23 = vpack.c.bf16 %v310_v17, %v309_v15  ;;  %v667_v24 = vpack.c.bf16 %v296_v19, %v295_v18  ;;  %v297_v30 = vld [vmem:[%s1192_s3 + $0xd0] sm:$0xff]  ;;  %v90_v4 = vshrl.u32 %v89_v7, 7 }
  0x2e   :  { %v279_v25 = vld [vmem:[%s1192_s3 + $0x40] sm:$0xff]  ;;  %v280_v26 = vld [vmem:[%s1192_s3 + $0x48] sm:$0xff]  ;;  %v699_v28 = vpack.c.bf16 %v328_v21, %v327_v20  ;;  %v298_v31 = vld [vmem:[%s1192_s3 + $0xd8] sm:$0xff] }
  0x2f   :  { %662 = vmatpush3.bf16.msra.mxu0 %v661_v10  ;;  %v311_v27 = vld [vmem:[%s1192_s3 + $0x140] sm:$0xff]  ;;  %v312_v29 = vld [vmem:[%s1192_s3 + $0x148] sm:$0xff]  ;;  %v329_v32 = vld [vmem:[%s1192_s3 + $0x1d0] sm:$0xff]  ;;  %v669_v34 = vpack.c.bf16 %v280_v26, %v279_v25  ;;  %v671_v36 = vpack.c.bf16 %v298_v31, %v297_v30  ;;  %v91_v5 = vsub.s32 0, %v90_v4  ;;  %v99_v8 = vsub.s32 2, %v90_v4 }
  0x30   :  { %694 = vmatpush3.bf16.msra.mxu1 %v693_v11  ;;  %664 = vmatprep.subr.bf16.mxu0 %v663_v12  ;;  %v330_v33 = vld [vmem:[%s1192_s3 + $0x1d8] sm:$0xff]  ;;  %v701_v35 = vpack.c.bf16 %v312_v29, %v311_v27  ;;  %v281_v37 = vld [vmem:[%s1192_s3 + $0x50] sm:$0xff]  ;;  %v299_v42 = vld [vmem:[%s1192_s3 + $0xe0] sm:$0xff]  ;;  %v95_v9 = vsub.s32 1, %v90_v4  ;;  %v103_v10 = vsub.s32 3, %v90_v4 }
  0x31   :  { %696 = vmatprep.subr.bf16.mxu1 %v695_v16  ;;  %v282_v38 = vld [vmem:[%s1192_s3 + $0x58] sm:$0xff]  ;;  %v313_v39 = vld [vmem:[%s1192_s3 + $0x150] sm:$0xff]  ;;  %v703_v40 = vpack.c.bf16 %v330_v33, %v329_v32  ;;  %v300_v43 = vld [vmem:[%s1192_s3 + $0xe8] sm:$0xff] }
  0x32   :  { %v314_v41 = vld [vmem:[%s1192_s3 + $0x158] sm:$0xff]  ;;  %v331_v44 = vld [vmem:[%s1192_s3 + $0x1e0] sm:$0xff]  ;;  %v332_v45 = vld [vmem:[%s1192_s3 + $0x1e8] sm:$0xff]  ;;  %v673_v46 = vpack.c.bf16 %v282_v38, %v281_v37  ;;  %v675_v48 = vpack.c.bf16 %v300_v43, %v299_v42 }
  0x33   :  { %666 = vmatpush3.bf16.msra.mxu0 %v665_v22  ;;  %v705_v47 = vpack.c.bf16 %v314_v41, %v313_v39  ;;  %v707_v49 = vpack.c.bf16 %v332_v45, %v331_v44  ;;  %v283_v50 = vld [vmem:[%s1192_s3 + $0x60] sm:$0xff]  ;;  %v284_v51 = vld [vmem:[%s1192_s3 + $0x68] sm:$0xff]  ;;  %v301_v56 = vld [vmem:[%s1192_s3 + $0xf0] sm:$0xff] }
  0x34   :  { %698 = vmatpush3.bf16.msra.mxu1 %v697_v23  ;;  %668 = vmatprep.subr.bf16.mxu0 %v667_v24  ;;  %v315_v52 = vld [vmem:[%s1192_s3 + $0x160] sm:$0xff]  ;;  %v677_v53 = vpack.c.bf16 %v284_v51, %v283_v50  ;;  %v316_v54 = vld [vmem:[%s1192_s3 + $0x168] sm:$0xff]  ;;  %v302_v57 = vld [vmem:[%s1192_s3 + $0xf8] sm:$0xff] }
  0x35   :  { %700 = vmatprep.subr.bf16.mxu1 %v699_v28  ;;  %v709_v55 = vpack.c.bf16 %v316_v54, %v315_v52  ;;  %v333_v58 = vld [vmem:[%s1192_s3 + $0x1f0] sm:$0xff]  ;;  %v679_v59 = vpack.c.bf16 %v302_v57, %v301_v56  ;;  %v334_v60 = vld [vmem:[%s1192_s3 + $0x1f8] sm:$0xff]  ;;  %v87_v6 = vld [vmem:[%s1191_s2] sm:$0xf] }
  0x36   :  { %v285_v61 = vld [vmem:[%s1192_s3 + $0x70] sm:$0xff]  ;;  %v286_v62 = vld [vmem:[%s1192_s3 + $0x78] sm:$0xff]  ;;  %v711_v63 = vpack.c.bf16 %v334_v60, %v333_v58  ;;  %v92_v11 = vrot.slane %v87_v6, %v91_v5  ;;  %v100_v12 = vrot.slane %v87_v6, %v99_v8  ;;  %v96_v13 = vrot.slane %v87_v6, %v95_v9  ;;  %v510_v41 = vld [vmem:[%s1193_s4] ss:$0 sm:$0xff]  ;;  %s719_s4 = scalar_lea.vmem %s500_s22, 256 }
  0x37   :  { %670 = vmatpush3.bf16.msra.mxu0 %v669_v34  ;;  %v681_v0 = vpack.c.bf16 %v286_v62, %v285_v61  ;;  %v317_v1 = vld [vmem:[%s1192_s3 + $0x170] sm:$0xff]  ;;  %v318_v2 = vld [vmem:[%s1192_s3 + $0x178] sm:$0xff]  ;;  %v104_v14 = vrot.slane %v87_v6, %v103_v10  ;;  %p720_p0 = scmp.ne.s32.totalorder %s500_s22, %s719_s4  ;;  %p725_p2 = scmp.lt.s32.totalorder %s719_s4, %s719_s4 }
  0x38   :  { %702 = vmatpush3.bf16.msra.mxu1 %v701_v35  ;;  %672 = vmatprep.subr.bf16.mxu0 %v671_v36  ;;  %v713_v3 = vpack.c.bf16 %v318_v2, %v317_v1 }
  0x39   :  { %704 = vmatprep.subr.bf16.mxu1 %v703_v40  ;;  %p726_p3 = por %p725_p2, %p724_p1 }
  0x3b   :  { %674 = vmatpush3.bf16.msra.mxu0 %v673_v46  ;;  %p727_p4 = pnand %p726_p3, %p720_p0 }
  0x3c   :  { %706 = vmatpush3.bf16.msra.mxu1 %v705_v47  ;;  %676 = vmatprep.subr.bf16.mxu0 %v675_v48 }
  0x3d   :  { %708 = vmatprep.subr.bf16.mxu1 %v707_v49 }
  0x3f   :  { %678 = vmatpush3.bf16.msra.mxu0 %v677_v53 }
  0x40   :  { %710 = vmatpush3.bf16.msra.mxu1 %v709_v55  ;;  %680 = vmatprep.subr.bf16.mxu0 %v679_v59 }
  0x41   :  { %712 = vmatprep.subr.bf16.mxu1 %v711_v63 }
  0x43   :  { %682 = vmatpush3.bf16.msra.mxu0 %v681_v0 }
  0x44   :  { %714 = vmatpush3.bf16.msra.mxu1 %v713_v3 }
  0xf8   :  { %v175_v15 = vpop.f32.mrb[0].mxu0 }
  0xf9   :  { %v176_v16 = vadd.f32 %v175_v15, %v92_v11  ;;  %v252_v17 = vpop.f32.mrb[0].mxu1  ;;  %v177_v18 = vpop.f32.mrb[1].mxu0 }
  0xfa   :  { %v253_v19 = vadd.f32 %v252_v17, %v100_v12  ;;  %v178_v20 = vadd.f32 %v177_v18, %v96_v13  ;;  %v254_v21 = vpop.f32.mrb[1].mxu1 }
  0xfb   :  { %v255_v22 = vadd.f32 %v254_v21, %v104_v14  ;;  %v263_v26 = vmax.f32 %v176_v16, 0.0 }
  0xfc   :  { %v265_v23 = vmax.f32 %v253_v19, 0.0  ;;  %v264_v24 = vmax.f32 %v178_v20, 0.0  ;;  %v181_v25 = vpop.f32.mrb[2].mxu0 }
  0xfd   :  { %v266_v27 = vmax.f32 %v255_v22, 0.0  ;;  %v182_v28 = vadd.f32 %v181_v25, %v92_v11  ;;  %v258_v29 = vpop.f32.mrb[2].mxu1  ;;  %v183_v30 = vpop.f32.mrb[3].mxu0 }
  0xfe   :  { %v259_v31 = vadd.f32 %v258_v29, %v100_v12  ;;  %v184_v32 = vadd.f32 %v183_v30, %v96_v13  ;;  %v260_v33 = vpop.f32.mrb[3].mxu1  ;;  %406 = vmatprep.mubr.f32.mxu0 %v264_v24 }
  0xff   :  { %v261_v34 = vadd.f32 %v260_v33, %v104_v14  ;;  %481 = vmatprep.mubr.f32.mxu1 %v266_v27  ;;  %407 = vmatmul.mubr.f32.vlgmr.msra.gmra.mrb[4].mxu0 %v263_v26  ;;  %v267_v37 = vmax.f32 %v182_v28, 0.0 }
 0x100   :  { %v269_v35 = vmax.f32 %v259_v31, 0.0  ;;  %v268_v36 = vmax.f32 %v184_v32, 0.0  ;;  %482 = vmatmul.mubr.f32.vlgmr.msra.gmra.mrb[4].mxu1 %v265_v23 }
 0x101   :  { %v270_v38 = vmax.f32 %v261_v34, 0.0 }
 0x102   :  { %411 = vmatprep.mubr.f32.mxu0 %v268_v36 }
 0x103   :  { %486 = vmatprep.mubr.f32.mxu1 %v270_v38  ;;  %412 = vmatmul.mubr.f32.gmra.mrb[6].mxu0 %v267_v37 }
 0x104   :  { %487 = vmatmul.mubr.f32.gmra.mrb[6].mxu1 %v269_v35 }
 0x1d2   :  { %v543_v39 = vpop.f32.mrb[4].mxu0 }
 0x1d3   :  { %v581_v40 = vpop.f32.mrb[4].mxu1  ;;  %v544_v42 = vpop.f32.mrb[5].mxu0 }
 0x1d4   :  { %v545_v43 = vadd.f32 %v544_v42, %v543_v39  ;;  %v582_v44 = vpop.f32.mrb[5].mxu1 }
 0x1d5   :  { %v583_v45 = vadd.f32 %v582_v44, %v581_v40 }
 0x1d6   :  { %v409_v46 = vadd.f32 %v545_v43, %v510_v41  ;;  %v546_v47 = vpop.f32.mrb[6].mxu0 }
 0x1d7   :  { %v584_v48 = vpop.f32.mrb[6].mxu1  ;;  %v547_v49 = vpop.f32.mrb[7].mxu0 }
 0x1d8   :  { %v484_v50 = vadd.f32 %v583_v45, %v409_v46  ;;  %v548_v51 = vadd.f32 %v547_v49, %v546_v47  ;;  %v585_v52 = vpop.f32.mrb[7].mxu1 }
 0x1d9   :  { %v586_v53 = vadd.f32 %v585_v52, %v584_v48 }
 0x1da   :  { %492 = vst [vmem:[#allocation2] sm:$0xff] %v484_v50  ;;  %v414_v54 = vadd.f32 %v548_v51, %v510_v41 }
 0x1dc   :  { %v489_v55 = vadd.f32 %v586_v53, %v414_v54 }
 0x1de   :  { %493 = vst [vmem:[#allocation2 + $0x8] sm:$0xff] %v489_v55 }
 0x1df   :  { %730 = shalt.err (!%p727_p4)
}
 0x1e0   :  { %s731_s25 = scalar_lea.hbm %s1194_s5, 256 }
 0x1e1   :  { %p732_p5 = scmp.ne.s32.totalorder %s1194_s5, %s731_s25  ;;  %p735_p6 = scmp.lt.u32.totalorder %s731_s25, %s1194_s5 }
 0x1e3   :  { %p737_p7 = pnand %p735_p6, %p732_p5 }
 0x1e5   :  { %740 = shalt.err (!%p737_p7)
}
 0x1e6   :  { %s745_s29 = smov 128   ;;  %s746_s30 = smov 8  }
 0x1e7   :  { %505 = dma.vmem_to_hbm [thread:$0]  %s500_s22, 256, %s1194_s5, [#allocation3], %s745_s29, %s745_s29, %s746_s30  }
 0x1e8   :  { %741 = dma.done.wait [#allocation3], 256  }
 0x1e9   :  { %742 = vsyncadd [#allocation3], 4294967040 }
 0x1ea   :  { %509 = vsyncpa [#allocation3], 1 }

</bundles_post_ra>
